<compile_context>
chip_gen: v6e
topology: v6e:2x2x1
jax: 0.10.0
libtpu: 0.0.40
codegen_flags: <defaults>
</compile_context>

<pallas_src>
import jax
import jax.numpy as jnp
import numpy as np
from jax.experimental import pallas as pl
from jax.experimental.pallas import tpu as pltpu


def _scale2_kernel(x_ref, o_ref):
    # Writes a value distinguishable from the input so the smoke test can
    # verify the kernel actually executed (an identity copy into an aliased
    # buffer would be indistinguishable from a no-op).
    o_ref[...] = x_ref[...] * 2.0


def _scale2_pallas_demo(x2d):
    """Whole-array, lane-dense x*2 kernel. Demo / smoke-test only.

    Expects a small 2-D f32 array with last dim a multiple of 128 and leading
    dim a multiple of 8 so the single block maps onto full (8, 128) vregs.
    Entire array lives in VMEM as one block; no grid needed at this size.
    NOTE: no input_output_aliases — aliasing would not elide the
    HBM->VMEM->HBM round trip (only the second output allocation, ~8 KiB),
    and donating the input is a footgun for future edits.
    """
    return pl.pallas_call(
        _scale2_kernel,
        out_shape=jax.ShapeDtypeStruct(x2d.shape, x2d.dtype),
        in_specs=[pl.BlockSpec(memory_space=pltpu.MemorySpace.VMEM)],
        out_specs=pl.BlockSpec(memory_space=pltpu.MemorySpace.VMEM),
    )(x2d)


def model_forward(x):
    """JAX equivalent of Model.forward: ignores x, returns (None, None).

    No Pallas / device work is performed here — the reference forward does no
    tensor computation, so any kernel call would be pure dead work (a full
    HBM read + write whose result is discarded).
    """
    del x
    # TODO(synk): reference forward assigns c = None, r = None and returns
    # them; there is no tensor computation to translate into a kernel.
    c_out = None
    r_out = None
    return (c_out, r_out)


if __name__ == "__main__":
    key = jax.random.PRNGKey(0)
    x = jax.random.normal(key, (2, 4, 16, 16), dtype=jnp.float32)

    # Forward pass: must match the reference semantics exactly.
    c, r = model_forward(x)
    assert c is None and r is None

    # Demo-only Pallas smoke test (not part of the forward pass).
    # Lane-dense reshape: 2*4*16*16 = 2048 elements -> (16, 128).
    x2d = x.reshape(-1, 128)
    y = _scale2_pallas_demo(x2d)
    jax.block_until_ready(y)
    assert y.shape == (16, 128)
    np.testing.assert_allclose(np.asarray(y), np.asarray(x2d) * 2.0,
                               rtol=1e-6, atol=1e-6)

    print("KERNEL_OK")
</pallas_src>

<mosaic_0001>
module attributes {stable_mosaic.version = 11 : i64} {
  func.func @_scale2_kernel(%arg0: memref<16x128xf32, #tpu.memory_space<vmem>>, %arg1: memref<16x128xf32, #tpu.memory_space<vmem>>) attributes {dimension_semantics = [], scalar_prefetch = 0 : i64, scratch_operands = 0 : i64, tpu.core_type = #tpu.core_type<tc>} {
    %c0 = arith.constant 0 : index
    %c0_0 = arith.constant 0 : index
    %0 = vector.load %arg0[%c0, %c0_0] : memref<16x128xf32, #tpu.memory_space<vmem>>, vector<16x128xf32>
    %cst = arith.constant 2.000000e+00 : f32
    %1 = vector.broadcast %cst : f32 to vector<16x128xf32>
    %2 = arith.mulf %0, %1 : vector<16x128xf32>
    %c0_1 = arith.constant 0 : index
    %c0_2 = arith.constant 0 : index
    %3 = vector.load %arg1[%c0_1, %c0_2] : memref<16x128xf32, #tpu.memory_space<vmem>>, vector<16x128xf32>
    tpu.vector_store %arg1[%c0_1, %c0_2], %2 {strides = array<i32>} : memref<16x128xf32, #tpu.memory_space<vmem>>, vector<16x128xf32>,
    return
  }
}

</mosaic_0001>

<bundles_post_ra>
// kernel: tpu_custom_call.1
= control target key start
LH: loop header
LB: loop body
LE: loop exit
PB: predicated region body
PF: predicated region fallthrough
CT: control target
= control target key end

     0   :  { %6 = vsyncpa [#allocation3], 0  ;;  %s114_s0 = inlined_call_operand.hbm [shape: f32[16,128], index: 0, kind: input, shape index: {}]   ;;  %s115_s1 = inlined_call_operand.hbm [shape: f32[16,128], index: 1, kind: output, shape index: {}]  }
   0x1   :  { %7 = vsyncpa [#allocation4], 0  ;;  %s94_s6 = smov [#allocation2]  }
   0x2   :  { %s13_s7 = sshll.u32 %s94_s6, 4  ;;  %s14_s7 = int_to_ptr.vmem [resolvable:$true] %s13_s7 }
   0x3   :  { %s58_s8 = scalar_lea.vmem %s14_s7, 256  ;;  %p63_p1 = scmp.lt.s32.totalorder %s14_s7, %s14_s7 }
   0x4   :  { %p59_p0 = scmp.ne.s32.totalorder %s14_s7, %s58_s8  ;;  %p64_p2 = scmp.lt.s32.totalorder %s58_s8, %s58_s8 }
   0x6   :  { %p65_p3 = por %p64_p2, %p63_p1 }
   0x8   :  { %p66_p4 = pnand %p65_p3, %p59_p0 }
   0xa   :  { %69 = shalt.err (!%p66_p4)
}
   0xb   :  { %s95_s9 = smov 128   ;;  %s96_s10 = smov 8  }
   0xc   :  { %19 = dma.hbm_to_vmem [thread:$0]  %s114_s0, 256, %s14_s7, [#allocation3], %s95_s9, %s95_s9, %s96_s10  }
   0xd   :  { %90 = dma.done.wait [#allocation3], 256  }
   0xe   :  { %91 = vsyncadd [#allocation3], 4294967040  ;;  %s97_s13 = smov [#allocation5]   ;;  %v23_v0 = vld [vmem:[#allocation2] sm:$0xff]  ;;  %v24_v1 = vld [vmem:[#allocation2 + $0x8] sm:$0xff] }
   0xf   :  { %s34_s14 = sshll.u32 %s97_s13, 4  ;;  %v25_v2 = vmul.f32 2.0, %v23_v0  ;;  %v26_v3 = vmul.f32 2.0, %v24_v1  ;;  %s35_s14 = int_to_ptr.vmem [resolvable:$true] %s34_s14 }
  0x10   :  { %s70_s15 = scalar_lea.vmem %s35_s14, 256  ;;  %p75_p6 = scmp.lt.s32.totalorder %s35_s14, %s35_s14 }
  0x11   :  { %27 = vst [vmem:[#allocation5] sm:$0xff] %v25_v2  ;;  %28 = vst [vmem:[#allocation5 + $0x8] sm:$0xff] %v26_v3  ;;  %p71_p5 = scmp.ne.s32.totalorder %s35_s14, %s70_s15  ;;  %p76_p7 = scmp.lt.s32.totalorder %s70_s15, %s70_s15 }
  0x13   :  { %p77_p8 = por %p76_p7, %p75_p6 }
  0x15   :  { %p78_p9 = pnand %p77_p8, %p71_p5 }
  0x17   :  { %81 = shalt.err (!%p78_p9)
}
  0x18   :  { %40 = dma.vmem_to_hbm [thread:$0]  %s35_s14, 256, %s115_s1, [#allocation4], %s95_s9, %s95_s9, %s96_s10  }
  0x19   :  { %92 = dma.done.wait [#allocation4], 256  }
  0x1a   :  { %93 = vsyncadd [#allocation4], 4294967040 }
  0x1b   :  { %44 = vsyncpa [#allocation3], 1 }
  0x1c   :  { %45 = vsyncpa [#allocation4], 1 }

</bundles_post_ra>
